<compile_context>
chip_gen: v7x
topology: tpu7x:2x2x1
jax: 0.10.0
libtpu: 0.0.40
codegen_flags: <defaults>
</compile_context>

<pallas_src>
import functools

import jax
import jax.numpy as jnp
from jax.experimental import pallas as pl
from jax.experimental.pallas import tpu as pltpu


def _mlp_fused_kernel(x_ref, w1_ref, b1_ref, w2_ref, b2_ref, o_ref):
    """Grid = (token_tile i, layer l).  o_ref is the resident activation carry."""
    l = pl.program_id(1)

    # First layer step for this token tile: seed the carry with the input tile.
    @pl.when(l == 0)
    def _():
        o_ref[...] = x_ref[...]

    x = o_ref[...]                                   # current activation (native dtype)
    h = jnp.dot(x, w1_ref[0], preferred_element_type=jnp.float32) + b1_ref[0]
    h = jnp.maximum(h, 0.0)                          # ReLU on the VPU
    y = jnp.dot(h.astype(w2_ref.dtype), w2_ref[0],
                preferred_element_type=jnp.float32) + b2_ref[0]
    # Dropout = identity (eval mode).
    o_ref[...] = y.astype(o_ref.dtype)               # carry -> next layer / final output


def _round_up(v, m):
    return ((v + m - 1) // m) * m


def mlp_forward_pallas(x, w1, b1, w2, b2, *, tm=128):
    """x: [..., D]; w1: [L,D,H]; b1: [L,1,H]; w2: [L,H,D]; b2: [L,1,D] -> [..., D]."""
    orig_shape = x.shape
    D = orig_shape[-1]
    L, _, H = w1.shape

    x2d = x.reshape(-1, D)
    M = x2d.shape[0]

    Dp = _round_up(D, 128)          # lane-dense last dims
    Hp = _round_up(H, 128)
    Mp = _round_up(M, tm)           # no divisibility assert; pad ragged tokens

    xp = jnp.pad(x2d, ((0, Mp - M), (0, Dp - D)))
    w1p = jnp.pad(w1, ((0, 0), (0, Dp - D), (0, Hp - H)))
    b1p = jnp.pad(b1, ((0, 0), (0, 0), (0, Hp - H)))
    w2p = jnp.pad(w2, ((0, 0), (0, Hp - H), (0, Dp - D)))
    b2p = jnp.pad(b2, ((0, 0), (0, 0), (0, Dp - D)))

    grid = (Mp // tm, L)

    # VMEM budget (double-buffered inputs + resident output + f32 intermediate).
    itemsize = jnp.dtype(x.dtype).itemsize
    est = (2 * (tm * Dp + Dp * Hp + Hp + Hp * Dp + Dp) * itemsize
           + 2 * tm * Dp * itemsize + tm * Hp * 4)
    cp_kwargs = {"dimension_semantics": ("parallel", "arbitrary")}
    if est > (16 << 20):            # only raise the scoped limit when needed
        cp_kwargs["vmem_limit_bytes"] = min(int(est * 1.25), 64 << 20)

    out = pl.pallas_call(
        _mlp_fused_kernel,
        out_shape=jax.ShapeDtypeStruct((Mp, Dp), x.dtype),
        grid_spec=pltpu.PrefetchScalarGridSpec(
            num_scalar_prefetch=0,
            grid=grid,
            in_specs=[
                pl.BlockSpec((tm, Dp), lambda i, l: (i, 0)),      # x tile
                pl.BlockSpec((1, Dp, Hp), lambda i, l: (l, 0, 0)),  # W1[l]
                pl.BlockSpec((1, 1, Hp), lambda i, l: (l, 0, 0)),   # b1[l]
                pl.BlockSpec((1, Hp, Dp), lambda i, l: (l, 0, 0)),  # W2[l]
                pl.BlockSpec((1, 1, Dp), lambda i, l: (l, 0, 0)),   # b2[l]
            ],
            out_specs=pl.BlockSpec((tm, Dp), lambda i, l: (i, 0)),  # resident carry
        ),
        compiler_params=pltpu.CompilerParams(**cp_kwargs),
    )(xp, w1p, b1p, w2p, b2p)

    return out[:M, :D].reshape(orig_shape)


def init_mlp_params(key, input_dim, hidden_dim, layers):
    """PyTorch-style Linear init U(-1/sqrt(fan_in), 1/sqrt(fan_in)); weights stored [in,out]."""
    w1s, b1s, w2s, b2s = [], [], [], []
    for _ in range(layers):
        key, k1, k2, k3, k4 = jax.random.split(key, 5)
        bound1 = 1.0 / jnp.sqrt(jnp.float32(input_dim))
        bound2 = 1.0 / jnp.sqrt(jnp.float32(hidden_dim))
        w1s.append(jax.random.uniform(k1, (input_dim, hidden_dim), jnp.float32, -bound1, bound1))
        b1s.append(jax.random.uniform(k2, (1, hidden_dim), jnp.float32, -bound1, bound1))
        w2s.append(jax.random.uniform(k3, (hidden_dim, input_dim), jnp.float32, -bound2, bound2))
        b2s.append(jax.random.uniform(k4, (1, input_dim), jnp.float32, -bound2, bound2))
    return (jnp.stack(w1s), jnp.stack(b1s), jnp.stack(w2s), jnp.stack(b2s))


def mlp_reference(x, w1, b1, w2, b2):
    """Pure-JAX reference of the same forward (eval mode)."""
    orig_shape = x.shape
    x2d = x.reshape(-1, orig_shape[-1])
    for l in range(w1.shape[0]):
        h = jnp.maximum(x2d @ w1[l] + b1[l], 0.0)
        x2d = h @ w2[l] + b2[l]
    return x2d.reshape(orig_shape)


if __name__ == "__main__":
    key = jax.random.PRNGKey(0)
    batch, seq, input_dim, hidden_dim, layers = 2, 8, 32, 64, 2

    kx, kp = jax.random.split(key)
    x = jax.random.normal(kx, (batch, seq, input_dim), jnp.float32)
    w1, b1, w2, b2 = init_mlp_params(kp, input_dim, hidden_dim, layers)

    run = jax.jit(mlp_forward_pallas)
    out = run(x, w1, b1, w2, b2)
    out = jax.block_until_ready(out)

    ref = mlp_reference(x, w1, b1, w2, b2)
    assert out.shape == x.shape
    assert jnp.allclose(out, ref, atol=1e-5, rtol=1e-5), "mismatch vs reference"

    print("KERNEL_OK")
</pallas_src>

<mosaic_0001>
module attributes {stable_mosaic.version = 11 : i64} {
  func.func @_mlp_fused_kernel(%arg0: i32, %arg1: i32, %arg2: memref<128x128xf32, #tpu.memory_space<vmem>>, %arg3: memref<1x128x128xf32, #tpu.memory_space<vmem>>, %arg4: memref<1x1x128xf32, #tpu.memory_space<vmem>>, %arg5: memref<1x128x128xf32, #tpu.memory_space<vmem>>, %arg6: memref<1x1x128xf32, #tpu.memory_space<vmem>>, %arg7: memref<128x128xf32, #tpu.memory_space<vmem>>) attributes {dimension_semantics = [#tpu.dimension_semantics<parallel>, #tpu.dimension_semantics<arbitrary>], iteration_bounds = array<i64: 1, 2>, scalar_prefetch = 0 : i64, scratch_operands = 0 : i64, tpu.core_type = #tpu.core_type<tc>, window_params = [{transform_indices = @transform_0, window_bounds = array<i64: 128, 128>}, {transform_indices = @transform_1, window_bounds = array<i64: 1, 128, 128>}, {transform_indices = @transform_2, window_bounds = array<i64: 1, 1, 128>}, {transform_indices = @transform_3, window_bounds = array<i64: 1, 128, 128>}, {transform_indices = @transform_4, window_bounds = array<i64: 1, 1, 128>}, {transform_indices = @transform_5, window_bounds = array<i64: 128, 128>}]} {
    %c0_i32 = arith.constant 0 : i32
    %0 = arith.cmpi eq, %arg1, %c0_i32 : i32
    %1 = arith.extui %0 : i1 to i32
    %c0_i32_0 = arith.constant 0 : i32
    %2 = arith.cmpi ne, %1, %c0_i32_0 : i32
    scf.if %2 {
      %c0_18 = arith.constant 0 : index
      %c0_19 = arith.constant 0 : index
      %21 = vector.load %arg2[%c0_18, %c0_19] : memref<128x128xf32, #tpu.memory_space<vmem>>, vector<128x128xf32>
      %c0_20 = arith.constant 0 : index
      %c0_21 = arith.constant 0 : index
      %22 = vector.load %arg7[%c0_20, %c0_21] : memref<128x128xf32, #tpu.memory_space<vmem>>, vector<128x128xf32>
      tpu.vector_store %arg7[%c0_20, %c0_21], %21 {strides = array<i32>} : memref<128x128xf32, #tpu.memory_space<vmem>>, vector<128x128xf32>,
    } else {
    }
    %c0 = arith.constant 0 : index
    %c0_1 = arith.constant 0 : index
    %3 = vector.load %arg7[%c0, %c0_1] : memref<128x128xf32, #tpu.memory_space<vmem>>, vector<128x128xf32>
    %c0_2 = arith.constant 0 : index
    %c0_3 = arith.constant 0 : index
    %c0_4 = arith.constant 0 : index
    %4 = vector.load %arg3[%c0_2, %c0_3, %c0_4] : memref<1x128x128xf32, #tpu.memory_space<vmem>>, vector<1x128x128xf32>
    %5 = vector.shape_cast %4 : vector<1x128x128xf32> to vector<128x128xf32>
    %cst = arith.constant dense<0.000000e+00> : vector<128x128xf32>
    %6 = tpu.matmul %3, %5, %cst {dimension_numbers = #tpu.dot_dimension_numbers<[1], [0], [0], [1], [0, 0, 1, 1], [], []>} : vector<128x128xf32>, vector<128x128xf32>, vector<128x128xf32> -> vector<128x128xf32>
    %c0_5 = arith.constant 0 : index
    %c0_6 = arith.constant 0 : index
    %c0_7 = arith.constant 0 : index
    %7 = vector.load %arg4[%c0_5, %c0_6, %c0_7] : memref<1x1x128xf32, #tpu.memory_space<vmem>>, vector<1x1x128xf32>
    %8 = vector.shape_cast %7 : vector<1x1x128xf32> to vector<1x128xf32>
    %9 = vector.broadcast %8 : vector<1x128xf32> to vector<128x128xf32>
    %10 = arith.addf %6, %9 : vector<128x128xf32>
    %cst_8 = arith.constant 0.000000e+00 : f32
    %11 = vector.broadcast %cst_8 : f32 to vector<128x128xf32>
    %12 = arith.maximumf %10, %11 : vector<128x128xf32>
    %c0_9 = arith.constant 0 : index
    %c0_10 = arith.constant 0 : index
    %c0_11 = arith.constant 0 : index
    %13 = vector.load %arg5[%c0_9, %c0_10, %c0_11] : memref<1x128x128xf32, #tpu.memory_space<vmem>>, vector<1x128x128xf32>
    %14 = vector.shape_cast %13 : vector<1x128x128xf32> to vector<128x128xf32>
    %cst_12 = arith.constant dense<0.000000e+00> : vector<128x128xf32>
    %15 = tpu.matmul %12, %14, %cst_12 {dimension_numbers = #tpu.dot_dimension_numbers<[1], [0], [0], [1], [0, 0, 1, 1], [], []>} : vector<128x128xf32>, vector<128x128xf32>, vector<128x128xf32> -> vector<128x128xf32>
    %c0_13 = arith.constant 0 : index
    %c0_14 = arith.constant 0 : index
    %c0_15 = arith.constant 0 : index
    %16 = vector.load %arg6[%c0_13, %c0_14, %c0_15] : memref<1x1x128xf32, #tpu.memory_space<vmem>>, vector<1x1x128xf32>
    %17 = vector.shape_cast %16 : vector<1x1x128xf32> to vector<1x128xf32>
    %18 = vector.broadcast %17 : vector<1x128xf32> to vector<128x128xf32>
    %19 = arith.addf %15, %18 : vector<128x128xf32>
    %c0_16 = arith.constant 0 : index
    %c0_17 = arith.constant 0 : index
    %20 = vector.load %arg7[%c0_16, %c0_17] : memref<128x128xf32, #tpu.memory_space<vmem>>, vector<128x128xf32>
    tpu.vector_store %arg7[%c0_16, %c0_17], %19 {strides = array<i32>} : memref<128x128xf32, #tpu.memory_space<vmem>>, vector<128x128xf32>,
    return
  }
  func.func @transform_0(%arg0: i32, %arg1: i32) -> (i32, i32) {
    %c0_i32 = arith.constant 0 : i32
    %c0_i32_0 = arith.constant 0 : i32
    return %arg0, %c0_i32 : i32, i32
  }
  func.func @transform_1(%arg0: i32, %arg1: i32) -> (i32, i32, i32) {
    %c0_i32 = arith.constant 0 : i32
    %c0_i32_0 = arith.constant 0 : i32
    %c0_i32_1 = arith.constant 0 : i32
    return %arg1, %c0_i32, %c0_i32_0 : i32, i32, i32
  }
  func.func @transform_2(%arg0: i32, %arg1: i32) -> (i32, i32, i32) {
    %c0_i32 = arith.constant 0 : i32
    %c0_i32_0 = arith.constant 0 : i32
    %c0_i32_1 = arith.constant 0 : i32
    return %arg1, %c0_i32, %c0_i32_0 : i32, i32, i32
  }
  func.func @transform_3(%arg0: i32, %arg1: i32) -> (i32, i32, i32) {
    %c0_i32 = arith.constant 0 : i32
    %c0_i32_0 = arith.constant 0 : i32
    %c0_i32_1 = arith.constant 0 : i32
    return %arg1, %c0_i32, %c0_i32_0 : i32, i32, i32
  }
  func.func @transform_4(%arg0: i32, %arg1: i32) -> (i32, i32, i32) {
    %c0_i32 = arith.constant 0 : i32
    %c0_i32_0 = arith.constant 0 : i32
    %c0_i32_1 = arith.constant 0 : i32
    return %arg1, %c0_i32, %c0_i32_0 : i32, i32, i32
  }
  func.func @transform_5(%arg0: i32, %arg1: i32) -> (i32, i32) {
    %c0_i32 = arith.constant 0 : i32
    %c0_i32_0 = arith.constant 0 : i32
    return %arg0, %c0_i32 : i32, i32
  }
}

</mosaic_0001>

<bundles_post_ra>
// kernel: mlp_forward_pallas.1
= control target key start
LH: loop header
LB: loop body
LE: loop exit
PB: predicated region body
PF: predicated region fallthrough
CT: control target
= control target key end

     0   :  { %s1171_s18 = smov 0   ;;  %s1173_s19 = smov 0   ;;  %s1453_s0 = inlined_call_operand.vmem [shape: f32[128,128], index: 0, kind: input, shape index: {}]   ;;  %s1454_s1 = inlined_call_operand.vmem [shape: f32[2,128,128], index: 1, kind: input, shape index: {}]   ;;  %s1455_s2 = inlined_call_operand.vmem [shape: f32[2,1,128], index: 2, kind: input, shape index: {}]   ;;  %s1456_s3 = inlined_call_operand.vmem [shape: f32[2,128,128], index: 3, kind: input, shape index: {}]   ;;  %s1457_s4 = inlined_call_operand.vmem [shape: f32[2,1,128], index: 4, kind: input, shape index: {}]   ;;  %s1458_s5 = inlined_call_operand.vmem [shape: f32[128,128], index: 5, kind: output, shape index: {}]  }
   0x1   :  { %s1175_s20 = smov 0  }
   0x2 LB: > { %s24_s21 = sadd.s32 1, %s1135_s19  ;;  %p839_p0 = scmp.ge.s32.totalorder %s1139_s20, 1  ;;  %s1139_s20 = sphi %s1175_s20, %s15_s20   ;;  %s1135_s19 = sphi %s1173_s19, %s1460_s19   ;;  %s1131_s18 = sphi %s1171_s18, %s1459_s18  }
   0x3   : > { %p25_p1 = scmp.ge.s32.totalorder %s24_s21, 2  ;;  %p236_p2 = scmp.lt.s32.totalorder %s1139_s20, 3 }
   0x5   : > { %s1462_s21 = smov (%p25_p1, %s24_s21), 0  ;;  %p237_p3 = pnand %p839_p0, %p236_p2 }
   0x6   : > { %p286_p4 = scmp.lt.s32.totalorder (!%p237_p3), %s1131_s18, 1  ;;  %p844_p5 = scmp.ne.s32.totalorder (!%p237_p3), %s1131_s18, 0 }
   0x7   : > { %240 = sbr.rel (%p237_p3) target bundleno = 521 (0x209), region = 40 }
   0xe   : > { %s1189_s22 = scalar_select %p286_p4, %s1131_s18, 1 }
   0xf   : > { %311 = sbr.rel (%p844_p5) target bundleno = 24 (0x18), region = 44  ;;  %v312_v0 = vld [vmem:[%s1453_s0] sm:$0xff] (!%p844_p5)  ;;  %v313_v1 = vld [vmem:[%s1453_s0 + $0x8] sm:$0xff] (!%p844_p5)  ;;  %v314_v2 = vld [vmem:[%s1453_s0 + $0x10] sm:$0xff] (!%p844_p5) }
  0x10   : > { %s851_s23 = sshll.u32 %s1189_s22, 7  ;;  %s293_s26 = scalar_lea.vmem %s1455_s2, %s1189_s22  ;;  %328 = vst [vmem:[%s1458_s5] sm:$0xff] (!%p844_p5), %v312_v0  ;;  %329 = vst [vmem:[%s1458_s5 + $0x8] sm:$0xff] (!%p844_p5), %v313_v1  ;;  %v315_v3 = vld [vmem:[%s1453_s0 + $0x18] sm:$0xff] (!%p844_p5)  ;;  %v316_v4 = vld [vmem:[%s1453_s0 + $0x20] sm:$0xff] (!%p844_p5) }
  0x11   : > { %s1199_s29 = scalar_lea.vmem %s1454_s1, %s851_s23  ;;  %s1204_s7 = scalar_lea.vmem %s1456_s3, %s851_s23  ;;  %330 = vst [vmem:[%s1458_s5 + $0x10] sm:$0xff] (!%p844_p5), %v314_v2  ;;  %v317_v5 = vld [vmem:[%s1453_s0 + $0x28] sm:$0xff] (!%p844_p5)  ;;  %331 = vst [vmem:[%s1458_s5 + $0x18] sm:$0xff] (!%p844_p5), %v315_v3  ;;  %v318_v6 = vld [vmem:[%s1453_s0 + $0x30] sm:$0xff] (!%p844_p5) }
  0x12   : > { %s301_s10 = scalar_lea.vmem %s1457_s4, %s1189_s22  ;;  %332 = vst [vmem:[%s1458_s5 + $0x20] sm:$0xff] (!%p844_p5), %v316_v4  ;;  %333 = vst [vmem:[%s1458_s5 + $0x28] sm:$0xff] (!%p844_p5), %v317_v5  ;;  %v319_v7 = vld [vmem:[%s1453_s0 + $0x38] sm:$0xff] (!%p844_p5)  ;;  %v320_v8 = vld [vmem:[%s1453_s0 + $0x40] sm:$0xff] (!%p844_p5) }
  0x13   : > { %334 = vst [vmem:[%s1458_s5 + $0x30] sm:$0xff] (!%p844_p5), %v318_v6  ;;  %335 = vst [vmem:[%s1458_s5 + $0x38] sm:$0xff] (!%p844_p5), %v319_v7  ;;  %v321_v9 = vld [vmem:[%s1453_s0 + $0x48] sm:$0xff] (!%p844_p5)  ;;  %v322_v10 = vld [vmem:[%s1453_s0 + $0x50] sm:$0xff] (!%p844_p5) }
  0x14   : > { %336 = vst [vmem:[%s1458_s5 + $0x40] sm:$0xff] (!%p844_p5), %v320_v8  ;;  %v323_v11 = vld [vmem:[%s1453_s0 + $0x58] sm:$0xff] (!%p844_p5)  ;;  %337 = vst [vmem:[%s1458_s5 + $0x48] sm:$0xff] (!%p844_p5), %v321_v9  ;;  %v324_v12 = vld [vmem:[%s1453_s0 + $0x60] sm:$0xff] (!%p844_p5) }
  0x15   : > { %338 = vst [vmem:[%s1458_s5 + $0x50] sm:$0xff] (!%p844_p5), %v322_v10  ;;  %339 = vst [vmem:[%s1458_s5 + $0x58] sm:$0xff] (!%p844_p5), %v323_v11  ;;  %v325_v13 = vld [vmem:[%s1453_s0 + $0x68] sm:$0xff] (!%p844_p5)  ;;  %v326_v14 = vld [vmem:[%s1453_s0 + $0x70] sm:$0xff] (!%p844_p5) }
  0x16   : > { %340 = vst [vmem:[%s1458_s5 + $0x60] sm:$0xff] %v324_v12  ;;  %341 = vst [vmem:[%s1458_s5 + $0x68] sm:$0xff] %v325_v13  ;;  %v327_v15 = vld [vmem:[%s1453_s0 + $0x78] sm:$0xff] }
  0x17   : > { %342 = vst [vmem:[%s1458_s5 + $0x70] sm:$0xff] %v326_v14  ;;  %343 = vst [vmem:[%s1458_s5 + $0x78] sm:$0xff] %v327_v15 }
  0x18 PF: > { %v360_v16 = vld [vmem:[%s1199_s29] sm:$0xff]  ;;  %v361_v17 = vld [vmem:[%s1199_s29 + $0x8] sm:$0xff]  ;;  %v362_v18 = vld [vmem:[%s1199_s29 + $0x10] sm:$0xff] }
  0x19   : > { %v1029_v19 = vpack.c.bf16 %v361_v17, %v360_v16  ;;  %v363_v20 = vld [vmem:[%s1199_s29 + $0x18] sm:$0xff]  ;;  %v364_v22 = vld [vmem:[%s1199_s29 + $0x20] sm:$0xff]  ;;  %v365_v23 = vld [vmem:[%s1199_s29 + $0x28] sm:$0xff] }
  0x1a   : > { %v1033_v21 = vpack.c.bf16 %v363_v20, %v362_v18  ;;  %v1037_v24 = vpack.c.bf16 %v365_v23, %v364_v22  ;;  %v344_v25 = vld [vmem:[%s1458_s5] sm:$0xff]  ;;  %v366_v26 = vld [vmem:[%s1199_s29 + $0x30] sm:$0xff]  ;;  %v367_v27 = vld [vmem:[%s1199_s29 + $0x38] sm:$0xff] }
  0x1b   : > { %1030 = vmatprep.subr.bf16.mxu0 %v1029_v19  ;;  %949 = vmatprep.mubr.f32.mxu0 %v344_v25  ;;  %v1041_v28 = vpack.c.bf16 %v367_v27, %v366_v26  ;;  %v368_v29 = vld [vmem:[%s1199_s29 + $0x40] sm:$0xff]  ;;  %v369_v30 = vld [vmem:[%s1199_s29 + $0x48] sm:$0xff]  ;;  %v546_v33 = vld [vmem:[%s1204_s7 + $0x10] sm:$0xff] }
  0x1c   : > { %1032 = vmatpush3.bf16.msra.mxu0 %v1029_v19  ;;  %v544_v31 = vld [vmem:[%s1204_s7] sm:$0xff]  ;;  %v545_v32 = vld [vmem:[%s1204_s7 + $0x8] sm:$0xff]  ;;  %v547_v34 = vld [vmem:[%s1204_s7 + $0x18] sm:$0xff]  ;;  %v1045_v37 = vpack.c.bf16 %v369_v30, %v368_v29 }
  0x1d   : > { %1034 = vmatprep.subr.bf16.mxu0 %v1033_v21  ;;  %v1061_v35 = vpack.c.bf16 %v545_v32, %v544_v31  ;;  %v1065_v36 = vpack.c.bf16 %v547_v34, %v546_v33  ;;  %v548_v38 = vld [vmem:[%s1204_s7 + $0x20] sm:$0xff]  ;;  %v549_v39 = vld [vmem:[%s1204_s7 + $0x28] sm:$0xff]  ;;  %v370_v40 = vld [vmem:[%s1199_s29 + $0x50] sm:$0xff] }
  0x1e   : > { %v371_v41 = vld [vmem:[%s1199_s29 + $0x58] sm:$0xff]  ;;  %v1069_v42 = vpack.c.bf16 %v549_v39, %v548_v38  ;;  %v550_v44 = vld [vmem:[%s1204_s7 + $0x30] sm:$0xff]  ;;  %v372_v46 = vld [vmem:[%s1199_s29 + $0x60] sm:$0xff] }
  0x1f   : > { %1062 = vmatprep.subr.bf16.mxu1 %v1061_v35  ;;  %v1049_v43 = vpack.c.bf16 %v371_v41, %v370_v40  ;;  %v551_v45 = vld [vmem:[%s1204_s7 + $0x38] sm:$0xff]  ;;  %v373_v47 = vld [vmem:[%s1199_s29 + $0x68] sm:$0xff]  ;;  %v552_v50 = vld [vmem:[%s1204_s7 + $0x40] sm:$0xff] }
  0x20   : > { %1036 = vmatpush3.bf16.msra.mxu0 %v1033_v21  ;;  %1064 = vmatpush3.bf16.msra.mxu1 %v1061_v35  ;;  %v1073_v48 = vpack.c.bf16 %v551_v45, %v550_v44  ;;  %v1053_v49 = vpack.c.bf16 %v373_v47, %v372_v46  ;;  %v553_v51 = vld [vmem:[%s1204_s7 + $0x48] sm:$0xff]  ;;  %v374_v52 = vld [vmem:[%s1199_s29 + $0x70] sm:$0xff]  ;;  %v375_v53 = vld [vmem:[%s1199_s29 + $0x78] sm:$0xff] }
  0x21   : > { %1038 = vmatprep.subr.bf16.mxu0 %v1037_v24  ;;  %1066 = vmatprep.subr.bf16.mxu1 %v1065_v36  ;;  %v1077_v54 = vpack.c.bf16 %v553_v51, %v552_v50  ;;  %v1057_v55 = vpack.c.bf16 %v375_v53, %v374_v52  ;;  %v554_v56 = vld [vmem:[%s1204_s7 + $0x50] sm:$0xff]  ;;  %v555_v57 = vld [vmem:[%s1204_s7 + $0x58] sm:$0xff]  ;;  %v556_v59 = vld [vmem:[%s1204_s7 + $0x60] sm:$0xff] }
  0x22   : > { %v1081_v58 = vpack.c.bf16 %v555_v57, %v554_v56  ;;  %v557_v60 = vld [vmem:[%s1204_s7 + $0x68] sm:$0xff]  ;;  %v346_v63 = vld [vmem:[%s1458_s5 + $0x10] sm:$0xff]  ;;  %v347_v0 = vld [vmem:[%s1458_s5 + $0x18] sm:$0xff] }
  0x23   : > { %v345_v61 = vld [vmem:[%s1458_s5 + $0x8] sm:$0xff]  ;;  %v1085_v62 = vpack.c.bf16 %v557_v60, %v556_v59  ;;  %v348_v1 = vld [vmem:[%s1458_s5 + $0x20] sm:$0xff]  ;;  %v350_v3 = vld [vmem:[%s1458_s5 + $0x30] sm:$0xff] }
  0x24   : > { %1040 = vmatpush3.bf16.msra.mxu0 %v1037_v24  ;;  %1068 = vmatpush3.bf16.msra.mxu1 %v1065_v36  ;;  %v349_v2 = vld [vmem:[%s1458_s5 + $0x28] sm:$0xff]  ;;  %v351_v4 = vld [vmem:[%s1458_s5 + $0x38] sm:$0xff]  ;;  %v352_v5 = vld [vmem:[%s1458_s5 + $0x40] sm:$0xff] }
  0x25   : > { %1042 = vmatprep.subr.bf16.mxu0 %v1041_v28  ;;  %1070 = vmatprep.subr.bf16.mxu1 %v1069_v42  ;;  %v353_v6 = vld [vmem:[%s1458_s5 + $0x48] sm:$0xff]  ;;  %v354_v7 = vld [vmem:[%s1458_s5 + $0x50] sm:$0xff]  ;;  %v355_v8 = vld [vmem:[%s1458_s5 + $0x58] sm:$0xff] }
  0x26   : > { %v356_v9 = vld [vmem:[%s1458_s5 + $0x60] sm:$0xff]  ;;  %v357_v10 = vld [vmem:[%s1458_s5 + $0x68] sm:$0xff]  ;;  %v358_v11 = vld [vmem:[%s1458_s5 + $0x70] sm:$0xff] }
  0x27   : > { %v359_v12 = vld [vmem:[%s1458_s5 + $0x78] sm:$0xff]  ;;  %v558_v13 = vld [vmem:[%s1204_s7 + $0x70] sm:$0xff]  ;;  %v845_v16 = vld [vmem:[%s293_s26] ss:$0 sm:$0xff] }
  0x28   : > { %1044 = vmatpush3.bf16.msra.mxu0 %v1041_v28  ;;  %1072 = vmatpush3.bf16.msra.mxu1 %v1069_v42  ;;  %v559_v14 = vld [vmem:[%s1204_s7 + $0x78] sm:$0xff] }
  0x29   : > { %1046 = vmatprep.subr.bf16.mxu0 %v1045_v37  ;;  %1074 = vmatprep.subr.bf16.mxu1 %v1073_v48  ;;  %v1089_v15 = vpack.c.bf16 %v559_v14, %v558_v13 }
  0x2c   : > { %1048 = vmatpush3.bf16.msra.mxu0 %v1045_v37  ;;  %1076 = vmatpush3.bf16.msra.mxu1 %v1073_v48 }
  0x2d   : > { %1050 = vmatprep.subr.bf16.mxu0 %v1049_v43  ;;  %1078 = vmatprep.subr.bf16.mxu1 %v1077_v54 }
  0x30   : > { %1052 = vmatpush3.bf16.msra.mxu0 %v1049_v43  ;;  %1080 = vmatpush3.bf16.msra.mxu1 %v1077_v54 }
  0x31   : > { %1054 = vmatprep.subr.bf16.mxu0 %v1053_v49  ;;  %1082 = vmatprep.subr.bf16.mxu1 %v1081_v58 }
  0x34   : > { %1056 = vmatpush3.bf16.msra.mxu0 %v1053_v49  ;;  %1084 = vmatpush3.bf16.msra.mxu1 %v1081_v58 }
  0x35   : > { %1058 = vmatprep.subr.bf16.mxu0 %v1057_v55  ;;  %1086 = vmatprep.subr.bf16.mxu1 %v1085_v62 }
  0x38   : > { %1060 = vmatpush3.bf16.msra.mxu0 %v1057_v55  ;;  %1088 = vmatpush3.bf16.msra.mxu1 %v1085_v62 }
  0x39   : > { %1090 = vmatprep.subr.bf16.mxu1 %v1089_v15 }
  0x3b   : > { %950 = vmatmul.mubr.f32.vlgmr.msra.gmra.mrb[0].mxu0 %v345_v61 }
  0x3c   : > { %952 = vmatprep.mubr.f32.mxu0 %v346_v63  ;;  %1092 = vmatpush3.bf16.msra.mxu1 %v1089_v15 }
  0x3f   : > { %953 = vmatmul.mubr.f32.gmra.mrb[2].mxu0 %v347_v0 }
  0x40   : > { %955 = vmatprep.mubr.f32.mxu0 %v348_v1  ;;  %v846_v1 = vld [vmem:[%s301_s10] ss:$0 sm:$0xff] }
  0x43   : > { %956 = vmatmul.mubr.f32.gmra.mrb[4].mxu0 %v349_v2 }
  0x44   : > { %958 = vmatprep.mubr.f32.mxu0 %v350_v3 }
  0x47   : > { %959 = vmatmul.mubr.f32.gmra.mrb[6].mxu0 %v351_v4 }
  0x48   : > { %961 = vmatprep.mubr.f32.mxu0 %v352_v5 }
  0x4b   : > { %962 = vmatmul.mubr.f32.gmra.mrb[8].mxu0 %v353_v6 }
  0x4c   : > { %964 = vmatprep.mubr.f32.mxu0 %v354_v7 }
  0x4f   : > { %965 = vmatmul.mubr.f32.gmra.mrb[10].mxu0 %v355_v8 }
  0x50   : > { %967 = vmatprep.mubr.f32.mxu0 %v356_v9 }
  0x53   : > { %968 = vmatmul.mubr.f32.gmra.mrb[12].mxu0 %v357_v10 }
  0x54   : > { %970 = vmatprep.mubr.f32.mxu0 %v358_v11 }
  0x57   : > { %971 = vmatmul.mubr.f32.gmra.mrb[14].mxu0 %v359_v12 }
 0x10e   : > { %v951_v17 = vpop.f32.mrb[0].mxu0 }
 0x10f   : > { %v455_v18 = vadd.f32 %v951_v17, %v845_v16  ;;  %v449_v19 = vpop.f32.mrb[1].mxu0 }
 0x110   : > { %v450_v20 = vadd.f32 %v845_v16, %v449_v19 }
 0x111   : > { %v529_v23 = vmax.f32 %v455_v18, 0.0 }
 0x112   : > { %v954_v21 = vpop.f32.mrb[2].mxu0  ;;  %v528_v22 = vmax.f32 %v450_v20, 0.0 }
 0x113   : > { %v465_v24 = vadd.f32 %v954_v21, %v845_v16  ;;  %v459_v25 = vpop.f32.mrb[3].mxu0 }
 0x114   : > { %v460_v26 = vadd.f32 %v845_v16, %v459_v25  ;;  %1005 = vmatprep.mubr.f32.mxu1 %v528_v22 }
 0x115   : > { %1006 = vmatmul.mubr.f32.vlgmr.msra.gmra.mrb[0].mxu1 %v529_v23  ;;  %v531_v29 = vmax.f32 %v465_v24, 0.0 }
 0x116   : > { %v530_v27 = vmax.f32 %v460_v26, 0.0  ;;  %v957_v28 = vpop.f32.mrb[4].mxu0 }
 0x117   : > { %v475_v30 = vadd.f32 %v957_v28, %v845_v16  ;;  %v469_v31 = vpop.f32.mrb[5].mxu0 }
 0x118   : > { %v470_v32 = vadd.f32 %v845_v16, %v469_v31  ;;  %1008 = vmatprep.mubr.f32.mxu1 %v530_v27 }
 0x119   : > { %1009 = vmatmul.mubr.f32.gmra.mrb[2].mxu1 %v531_v29  ;;  %v533_v35 = vmax.f32 %v475_v30, 0.0 }
 0x11a   : > { %v532_v33 = vmax.f32 %v470_v32, 0.0  ;;  %v960_v34 = vpop.f32.mrb[6].mxu0 }
 0x11b   : > { %v485_v36 = vadd.f32 %v960_v34, %v845_v16  ;;  %v479_v37 = vpop.f32.mrb[7].mxu0 }
 0x11c   : > { %v480_v38 = vadd.f32 %v845_v16, %v479_v37  ;;  %1011 = vmatprep.mubr.f32.mxu1 %v532_v33 }
 0x11d   : > { %1012 = vmatmul.mubr.f32.gmra.mrb[4].mxu1 %v533_v35  ;;  %v535_v41 = vmax.f32 %v485_v36, 0.0 }
 0x11e   : > { %v534_v39 = vmax.f32 %v480_v38, 0.0  ;;  %v963_v40 = vpop.f32.mrb[8].mxu0 }
 0x11f   : > { %v495_v42 = vadd.f32 %v963_v40, %v845_v16  ;;  %v489_v43 = vpop.f32.mrb[9].mxu0 }
 0x120   : > { %v490_v44 = vadd.f32 %v845_v16, %v489_v43  ;;  %1014 = vmatprep.mubr.f32.mxu1 %v534_v39 }
 0x121   : > { %1015 = vmatmul.mubr.f32.gmra.mrb[6].mxu1 %v535_v41  ;;  %v537_v47 = vmax.f32 %v495_v42, 0.0 }
 0x122   : > { %v536_v45 = vmax.f32 %v490_v44, 0.0  ;;  %v966_v46 = vpop.f32.mrb[10].mxu0 }
 0x123   : > { %v505_v48 = vadd.f32 %v966_v46, %v845_v16  ;;  %v499_v49 = vpop.f32.mrb[11].mxu0 }
 0x124   : > { %v500_v50 = vadd.f32 %v845_v16, %v499_v49  ;;  %1017 = vmatprep.mubr.f32.mxu1 %v536_v45 }
 0x125   : > { %1018 = vmatmul.mubr.f32.gmra.mrb[8].mxu1 %v537_v47  ;;  %v539_v53 = vmax.f32 %v505_v48, 0.0 }
 0x126   : > { %v538_v51 = vmax.f32 %v500_v50, 0.0  ;;  %v969_v52 = vpop.f32.mrb[12].mxu0 }
 0x127   : > { %v515_v54 = vadd.f32 %v969_v52, %v845_v16  ;;  %v509_v55 = vpop.f32.mrb[13].mxu0 }
 0x128   : > { %v510_v56 = vadd.f32 %v845_v16, %v509_v55  ;;  %1020 = vmatprep.mubr.f32.mxu1 %v538_v51 }
 0x129   : > { %1021 = vmatmul.mubr.f32.gmra.mrb[10].mxu1 %v539_v53  ;;  %v541_v59 = vmax.f32 %v515_v54, 0.0 }
 0x12a   : > { %v540_v57 = vmax.f32 %v510_v56, 0.0  ;;  %v972_v58 = vpop.f32.mrb[14].mxu0 }
 0x12b   : > { %v525_v60 = vadd.f32 %v972_v58, %v845_v16  ;;  %v519_v61 = vpop.f32.mrb[15].mxu0 }
 0x12c   : > { %v520_v62 = vadd.f32 %v845_v16, %v519_v61  ;;  %1023 = vmatprep.mubr.f32.mxu1 %v540_v57 }
 0x12d   : > { %1024 = vmatmul.mubr.f32.gmra.mrb[12].mxu1 %v541_v59  ;;  %v543_v0 = vmax.f32 %v525_v60, 0.0 }
 0x12e   : > { %v542_v63 = vmax.f32 %v520_v62, 0.0 }
 0x130   : > { %1026 = vmatprep.mubr.f32.mxu1 %v542_v63 }
 0x131   : > { %1027 = vmatmul.mubr.f32.gmra.mrb[14].mxu1 %v543_v0 }
 0x1e8   : > { %v1007_v2 = vpop.f32.mrb[0].mxu1 }
 0x1e9   : > { %v639_v3 = vadd.f32 %v1007_v2, %v846_v1  ;;  %v633_v4 = vpop.f32.mrb[1].mxu1 }
 0x1ea   : > { %v634_v5 = vadd.f32 %v846_v1, %v633_v4 }
 0x1eb   : > { %713 = vst [vmem:[%s1458_s5 + $0x8] sm:$0xff] %v639_v3 }
 0x1ec   : > { %712 = vst [vmem:[%s1458_s5] sm:$0xff] %v634_v5  ;;  %v1010_v6 = vpop.f32.mrb[2].mxu1 }
 0x1ed   : > { %v649_v7 = vadd.f32 %v1010_v6, %v846_v1  ;;  %v643_v8 = vpop.f32.mrb[3].mxu1 }
 0x1ee   : > { %v644_v9 = vadd.f32 %v846_v1, %v643_v8 }
 0x1ef   : > { %715 = vst [vmem:[%s1458_s5 + $0x18] sm:$0xff] %v649_v7 }
 0x1f0   : > { %714 = vst [vmem:[%s1458_s5 + $0x10] sm:$0xff] %v644_v9  ;;  %v1013_v10 = vpop.f32.mrb[4].mxu1 }
 0x1f1   : > { %v659_v11 = vadd.f32 %v1013_v10, %v846_v1  ;;  %v653_v12 = vpop.f32.mrb[5].mxu1 }
 0x1f2   : > { %v654_v13 = vadd.f32 %v846_v1, %v653_v12 }
 0x1f3   : > { %717 = vst [vmem:[%s1458_s5 + $0x28] sm:$0xff] %v659_v11 }
 0x1f4   : > { %716 = vst [vmem:[%s1458_s5 + $0x20] sm:$0xff] %v654_v13  ;;  %v1016_v14 = vpop.f32.mrb[6].mxu1 }
 0x1f5   : > { %v669_v15 = vadd.f32 %v1016_v14, %v846_v1  ;;  %v663_v16 = vpop.f32.mrb[7].mxu1 }
 0x1f6   : > { %v664_v17 = vadd.f32 %v846_v1, %v663_v16 }
 0x1f7   : > { %719 = vst [vmem:[%s1458_s5 + $0x38] sm:$0xff] %v669_v15 }
 0x1f8   : > { %718 = vst [vmem:[%s1458_s5 + $0x30] sm:$0xff] %v664_v17  ;;  %v1019_v18 = vpop.f32.mrb[8].mxu1 }
 0x1f9   : > { %v679_v19 = vadd.f32 %v1019_v18, %v846_v1  ;;  %v673_v20 = vpop.f32.mrb[9].mxu1 }
 0x1fa   : > { %v674_v21 = vadd.f32 %v846_v1, %v673_v20 }
 0x1fb   : > { %721 = vst [vmem:[%s1458_s5 + $0x48] sm:$0xff] %v679_v19 }
 0x1fc   : > { %720 = vst [vmem:[%s1458_s5 + $0x40] sm:$0xff] %v674_v21  ;;  %v1022_v22 = vpop.f32.mrb[10].mxu1 }
 0x1fd   : > { %v689_v23 = vadd.f32 %v1022_v22, %v846_v1  ;;  %v683_v24 = vpop.f32.mrb[11].mxu1 }
 0x1fe   : > { %v684_v25 = vadd.f32 %v846_v1, %v683_v24 }
 0x1ff   : > { %723 = vst [vmem:[%s1458_s5 + $0x58] sm:$0xff] %v689_v23 }
 0x200   : > { %722 = vst [vmem:[%s1458_s5 + $0x50] sm:$0xff] %v684_v25  ;;  %v1025_v26 = vpop.f32.mrb[12].mxu1 }
 0x201   : > { %v699_v27 = vadd.f32 %v1025_v26, %v846_v1  ;;  %v693_v28 = vpop.f32.mrb[13].mxu1 }
 0x202   : > { %v694_v29 = vadd.f32 %v846_v1, %v693_v28 }
 0x203   : > { %725 = vst [vmem:[%s1458_s5 + $0x68] sm:$0xff] %v699_v27 }
 0x204   : > { %724 = vst [vmem:[%s1458_s5 + $0x60] sm:$0xff] %v694_v29  ;;  %v1028_v30 = vpop.f32.mrb[14].mxu1 }
 0x205   : > { %v709_v31 = vadd.f32 %v1028_v30, %v846_v1  ;;  %v703_v32 = vpop.f32.mrb[15].mxu1 }
 0x206   : > { %v704_v33 = vadd.f32 %v846_v1, %v703_v32 }
 0x207   : > { %727 = vst [vmem:[%s1458_s5 + $0x78] sm:$0xff] %v709_v31 }
 0x208   : > { %726 = vst [vmem:[%s1458_s5 + $0x70] sm:$0xff] %v704_v33 }
 0x209 PF: > { %s15_s20 = sadd.s32 1, %s1139_s20   ;;  %s1459_s18 = smov %s1135_s19 }
 0x20a   : > { %p12_p6 = scmp.ge.s32.totalorder %s15_s20, 4   ;;  %s1460_s19 = smov %s1462_s21 }
 0x20c   :  { %14 = sbr.rel (!%p12_p6) target bundleno = 2 (0x2), region = 86 }

</bundles_post_ra>
